<compile_context>
chip_gen: v5e
topology: v5e:2x2
jax: 0.10.0
libtpu: 0.0.40
codegen_flags: <defaults>
</compile_context>

<pallas_src>
import functools
import math

import jax
import jax.numpy as jnp
import numpy as np
from jax.experimental import pallas as pl
from jax.experimental.pallas import tpu as pltpu

_MIB = 1024 * 1024
_NEG_BIG = -1e30   # finite "minus infinity" for padded logits / running max


def _round_up(x, m):
    return ((x + m - 1) // m) * m


def _cdiv(a, b):
    return -(-a // b)


def _tpu_vmem_and_cores():
    """Best-effort generation query: (usable per-core VMEM bytes, TC/chip)."""
    vmem = 128 * _MIB
    cores = 1
    try:
        kind = jax.devices()[0].device_kind.lower()
    except Exception:
        kind = ""
    if "v7" in kind or "7x" in kind:
        cores = 2                 # v7x: 2 TensorCores per chip
        vmem = 64 * _MIB          # v7x: 64 MiB VMEM per TC
    try:
        info = pltpu.get_tpu_info()
        vmem = min(vmem, int(getattr(info, "vmem_capacity_bytes", vmem)))
    except Exception:
        pass
    return vmem, cores


def _choose_tiles(rows_per_part, vocab, x_item, s_item, sublane, budget_bytes):
    """Pick (row_tile, v_tile, num_vocab_tiles) from a VMEM byte budget.

    Bytes per (row, vocab element) flowing through VMEM per grid step:
    double-buffered streams (2x each) plus ~4 f32 in-kernel tile intermediates.
    """
    per_elem = 2 * (x_item + s_item) + 16
    rows_needed = _round_up(max(rows_per_part, 1), sublane)

    rows_full = (budget_bytes // (per_elem * vocab)) // sublane * sublane
    if rows_full >= min(256, rows_needed):
        row_tile = min(max(rows_full, sublane), 1024, rows_needed)
        return row_tile, vocab, 1

    # Vocab too wide for a big row tile -> split the vocab axis and carry an
    # online log-sum-exp so rows stay in the HBM-roofline sweet spot.
    row_tile = min(512, rows_needed)
    v_tile = (budget_bytes // (per_elem * row_tile)) // 128 * 128
    v_tile = max(128, v_tile)
    if v_tile >= vocab:
        return row_tile, vocab, 1
    return row_tile, v_tile, _cdiv(vocab, v_tile)


# ----------------------------------------------------------------------------
# Pallas kernel
# ----------------------------------------------------------------------------
def _posterior_loss_kernel(*refs, include_hard, include_soft, padding_idx,
                           conf, low, hard_const, vocab, v_tile, nvt,
                           tiles_per_part, vocab_padded):
    it = iter(refs)
    x_ref = next(it)
    ids_ref = next(it)
    soft_ref = next(it) if include_soft else None
    ent_ref = next(it) if include_soft else None
    hard_out = next(it) if include_hard else None
    soft_out = next(it) if include_soft else None
    hard_acc = next(it) if include_hard else None   # per-part partial sums
    soft_acc = next(it) if include_soft else None
    m_scr = next(it)                                # running row max
    l_scr = next(it)                                # running row sum-exp
    wx_scr = next(it) if include_hard else None     # running sum(weight*x)
    sx_scr = next(it) if include_soft else None     # running sum(soft*x)
    ss_scr = next(it) if include_soft else None     # running sum(soft)

    i = pl.program_id(1)   # row-tile axis within a part ("arbitrary")
    k = pl.program_id(2)   # vocab axis ("arbitrary", innermost)

    @pl.when(jnp.logical_and(i == 0, k == 0))
    def _init_part():
        if include_hard:
            hard_acc[...] = jnp.zeros_like(hard_acc)
        if include_soft:
            soft_acc[...] = jnp.zeros_like(soft_acc)

    @pl.when(k == 0)
    def _init_rows():
        m_scr[...] = jnp.full_like(m_scr, _NEG_BIG)
        l_scr[...] = jnp.zeros_like(l_scr)
        if include_hard:
            wx_scr[...] = jnp.zeros_like(wx_scr)
        if include_soft:
            sx_scr[...] = jnp.zeros_like(sx_scr)
            ss_scr[...] = jnp.zeros_like(ss_scr)

    # Stream in native dtype (bf16-friendly); all math in f32.
    xf = x_ref[...].astype(jnp.float32)               # (row_tile, v_tile)
    r, vt = xf.shape

    # Online log-sum-exp over the vocab grid axis.  The other accumulators are
    # linear in x, so they never need rescaling.
    m_old = m_scr[...]
    m_new = jnp.maximum(m_old, jnp.max(xf, axis=-1, keepdims=True))
    l_scr[...] = (l_scr[...] * jnp.exp(m_old - m_new)
                  + jnp.sum(jnp.exp(xf - m_new), axis=-1, keepdims=True))
    m_scr[...] = m_new

    # ---------------- hard (label-smoothed) branch ----------------
    if include_hard:
        cols = k * v_tile + jax.lax.broadcasted_iota(jnp.int32, (r, vt), 1)
        tgt = ids_ref[:, 0:1]                          # (row_tile, 1) int32
        tgt_m = jnp.where(tgt == padding_idx, 0, tgt)
        if vocab_padded:
            off_w = jnp.where(cols < vocab, jnp.float32(low), jnp.float32(0.0))
        else:
            off_w = jnp.float32(low)
        wgt = jnp.where(cols == tgt_m, jnp.float32(conf), off_w)
        wx_scr[...] += jnp.sum(wgt * xf, axis=-1, keepdims=True)

    # ---------------- soft (posterior) branch ----------------
    if include_soft:
        sf = soft_ref[...].astype(jnp.float32)         # (row_tile, v_tile)
        sx_scr[...] += jnp.sum(sf * xf, axis=-1, keepdims=True)
        ss_scr[...] += jnp.sum(sf, axis=-1, keepdims=True)

    @pl.when(k == nvt - 1)
    def _finish_rows():
        logz = m_scr[...] + jnp.log(l_scr[...])        # (row_tile, 1)
        if include_hard:
            ign_h = ids_ref[:, 0:1] == padding_idx
            # sum weight == 1  =>  sum(weight*logp) = wx - logz
            row_hard = jnp.float32(hard_const) - wx_scr[...] + logz
            hard_acc[...] += jnp.where(ign_h, 0.0, row_hard)
        if include_soft:
            ob_col = 1 if include_hard else 0
            ign_s = ids_ref[:, ob_col:ob_col + 1] == padding_idx
            # KL row = sum xlogy(soft) - (sum(soft*x) - logz*sum(soft))
            row_soft = ent_ref[...] - sx_scr[...] + logz * ss_scr[...]
            soft_acc[...] += jnp.where(ign_s, 0.0, row_soft)

    @pl.when(jnp.logical_and(i == tiles_per_part - 1, k == nvt - 1))
    def _write_out():
        if include_hard:
            hard_out[...] = jnp.full(hard_out.shape, jnp.sum(hard_acc[...]),
                                     jnp.float32)
        if include_soft:
            soft_out[...] = jnp.full(soft_out.shape, jnp.sum(soft_acc[...]),
                                     jnp.float32)


# ----------------------------------------------------------------------------
# Wrapper: tiling / padding / grid setup, denominator & weight combination
# ----------------------------------------------------------------------------
def posterior_based_loss(x, target, pad_one_best, soft_target, soft_tgt_weight,
                         *, padding_idx, smoothing, normalize_length=False,
                         soft_entropy=None, soft_stream_dtype=jnp.bfloat16,
                         num_parts=None, row_tile=None, v_tile=None,
                         vmem_limit_bytes=None):
    B, S, V = x.shape
    N = B * S
    w = float(soft_tgt_weight)
    include_hard = (w != 1.0)
    include_soft = (w != 0.0)

    vmem_cap, detected_cores = _tpu_vmem_and_cores()
    if num_parts is None:
        num_parts = detected_cores
    if vmem_limit_bytes is None:
        vmem_limit_bytes = max(32 * _MIB, min(96 * _MIB, vmem_cap * 3 // 4))
    budget = vmem_limit_bytes - 2 * _MIB

    # ---- streams (x native dtype, soft targets downcast to bf16) ----
    x_flat = jnp.reshape(x, (N, V))
    soft_flat = None
    ent_flat = None
    if include_soft:
        soft_flat = jnp.reshape(soft_target, (N, V))
        if soft_entropy is None:
            sf32 = soft_flat.astype(jnp.float32)
            ent_flat = jnp.sum(jax.scipy.special.xlogy(sf32, sf32), axis=-1,
                               keepdims=True)
        else:
            ent_flat = jnp.reshape(soft_entropy, (N, 1)).astype(jnp.float32)
        if (soft_stream_dtype is not None
                and soft_flat.dtype != jnp.dtype(soft_stream_dtype)):
            soft_flat = soft_flat.astype(soft_stream_dtype)

    x_item = jnp.dtype(x.dtype).itemsize
    s_item = jnp.dtype(soft_flat.dtype).itemsize if include_soft else 0
    sublane = 16 if (x_item == 2 or s_item == 2) else 8

    # ---- tile sizes ----
    rows_per_part = _cdiv(N, num_parts)
    auto_rt, auto_vt, _ = _choose_tiles(rows_per_part, V, x_item, s_item,
                                        sublane, budget)
    if row_tile is None:
        row_tile = auto_rt
    if v_tile is None:
        v_tile = auto_vt
    row_tile = _round_up(int(row_tile), sublane)
    v_tile = min(int(v_tile), V)
    nvt = _cdiv(V, v_tile)
    if nvt > 1:
        v_tile = max(128, v_tile // 128 * 128)
        nvt = _cdiv(V, v_tile)
    if nvt == 1:
        v_tile = V

    tiles_per_part = _cdiv(rows_per_part, row_tile)
    n_rows_pad = num_parts * tiles_per_part * row_tile
    pad_rows = n_rows_pad - N
    v_pad_total = v_tile * nvt
    pad_cols = v_pad_total - V
    vocab_padded = pad_cols > 0

    # ---- pad rows / vocab (pad rows carry padding_idx => contribute 0;
    #      pad vocab columns get a huge-negative logit + zero weight) ----
    if pad_rows or pad_cols:
        x_flat = jnp.pad(x_flat, ((0, pad_rows), (0, pad_cols)),
                         constant_values=(_NEG_BIG if pad_cols else 0.0))

    id_cols = []
    if include_hard:
        id_cols.append(jnp.reshape(target, (N, 1)).astype(jnp.int32))
    if include_soft:
        id_cols.append(jnp.reshape(pad_one_best, (N, 1)).astype(jnp.int32))
    ids = id_cols[0] if len(id_cols) == 1 else jnp.concatenate(id_cols, axis=1)
    if pad_rows:
        ids = jnp.pad(ids, ((0, pad_rows), (0, 0)),
                      constant_values=int(padding_idx))

    xv_map = lambda c, i, k: (c * tiles_per_part + i, k)
    row_map = lambda c, i, k: (c * tiles_per_part + i, 0)

    inputs = [x_flat, ids]
    in_specs = [pl.BlockSpec((row_tile, v_tile), xv_map),
                pl.BlockSpec((row_tile, ids.shape[1]), row_map)]

    if include_soft:
        if pad_rows or pad_cols:
            soft_flat = jnp.pad(soft_flat, ((0, pad_rows), (0, pad_cols)))
        if pad_rows:
            ent_flat = jnp.pad(ent_flat, ((0, pad_rows), (0, 0)))
        inputs += [soft_flat, ent_flat]
        in_specs += [pl.BlockSpec((row_tile, v_tile), xv_map),
                     pl.BlockSpec((row_tile, 1), row_map)]

    n_out = int(include_hard) + int(include_soft)
    out_shapes = tuple(jax.ShapeDtypeStruct((num_parts, 8, 128), jnp.float32)
                       for _ in range(n_out))
    out_specs = tuple(pl.BlockSpec((1, 8, 128), lambda c, i, k: (c, 0, 0))
                      for _ in range(n_out))

    scratch = []
    if include_hard:
        scratch.append(pltpu.VMEM((row_tile, 1), jnp.float32))   # hard acc
    if include_soft:
        scratch.append(pltpu.VMEM((row_tile, 1), jnp.float32))   # soft acc
    scratch.append(pltpu.VMEM((row_tile, 1), jnp.float32))       # running max
    scratch.append(pltpu.VMEM((row_tile, 1), jnp.float32))       # running sumexp
    if include_hard:
        scratch.append(pltpu.VMEM((row_tile, 1), jnp.float32))   # sum(w*x)
    if include_soft:
        scratch.append(pltpu.VMEM((row_tile, 1), jnp.float32))   # sum(s*x)
        scratch.append(pltpu.VMEM((row_tile, 1), jnp.float32))   # sum(s)

    # compile-time constant: sum_v xlogy(true_dist_v)
    conf = 1.0 - smoothing
    low = smoothing / (V - 1)
    hard_const = 0.0
    if conf > 0.0:
        hard_const += conf * math.log(conf)
    if low > 0.0:
        hard_const += (V - 1) * low * math.log(low)

    if num_parts > 1:
        core_par = getattr(pltpu, "CORE_PARALLEL", None)
        if core_par is not None:
            dim_sem = (core_par, pltpu.ARBITRARY, pltpu.ARBITRARY)
        else:
            dim_sem = ("parallel", "arbitrary", "arbitrary")
    else:
        dim_sem = ("arbitrary", "arbitrary", "arbitrary")

    kernel = functools.partial(
        _posterior_loss_kernel,
        include_hard=include_hard, include_soft=include_soft,
        padding_idx=int(padding_idx), conf=conf, low=low,
        hard_const=hard_const, vocab=V, v_tile=v_tile, nvt=nvt,
        tiles_per_part=tiles_per_part, vocab_padded=vocab_padded)

    outs = pl.pallas_call(
        kernel,
        out_shape=out_shapes,
        grid_spec=pltpu.PrefetchScalarGridSpec(
            num_scalar_prefetch=0,
            grid=(num_parts, tiles_per_part, nvt),
            in_specs=in_specs,
            out_specs=out_specs,
            scratch_shapes=tuple(scratch)),
        compiler_params=pltpu.CompilerParams(
            dimension_semantics=dim_sem,
            vmem_limit_bytes=int(vmem_limit_bytes)),
    )(*inputs)

    idx = 0
    hard_sum = soft_sum = None
    if include_hard:
        hard_sum = jnp.sum(outs[idx][:, 0, 0]); idx += 1
    if include_soft:
        soft_sum = jnp.sum(outs[idx][:, 0, 0]); idx += 1

    if normalize_length:
        denom = jnp.sum((jnp.reshape(target, (-1,)) != padding_idx)
                        .astype(jnp.float32))
    else:
        denom = jnp.float32(B)

    if not include_soft:
        return hard_sum / denom
    if not include_hard:
        return soft_sum / denom
    return (1.0 - w) * (hard_sum / denom) + w * (soft_sum / denom)


# ----------------------------------------------------------------------------
# Host-side glue replicating padding_for_softloss (ragged python lists).
# Also returns the per-row soft-target entropy so the kernel never has to
# compute log(soft_target).
# ----------------------------------------------------------------------------
def padding_for_softloss(pred_max_len, hyps_list, sentences_scores_list, vocab):
    def _softmax(a):
        a = a - a.max(axis=1, keepdims=True)
        e = np.exp(a)
        return e / e.sum(axis=1, keepdims=True)

    def _xlogy(p):
        return np.where(p > 0, p * np.log(np.where(p > 0, p, 1.0)), 0.0)

    zero_pad = np.zeros((vocab,), np.float32)
    zero_pad[0] = 1.0

    pad_scores, pad_onebest, pad_entropy = [], [], []
    for i, scores in enumerate(sentences_scores_list):
        scores = np.asarray(scores, np.float32)
        one_best = list(hyps_list[i][0]['yseq'][1:])
        n = scores.shape[0]
        if n <= pred_max_len:
            sm = _softmax(scores)
            if pred_max_len - n > 0:
                sm = np.concatenate(
                    [sm, np.tile(zero_pad[None, :], (pred_max_len - n, 1))], 0)
            ob = one_best + [-1] * (pred_max_len - n)
        else:
            sm = _softmax(scores[:pred_max_len])
            ob = one_best[:pred_max_len]
        pad_scores.append(sm)
        pad_onebest.append(ob)
        pad_entropy.append(_xlogy(sm).sum(axis=1))
    return (np.asarray(pad_onebest, np.int32),
            np.asarray(pad_scores, np.float32),
            np.asarray(pad_entropy, np.float32))


# ----------------------------------------------------------------------------
# Pure-JAX reference (same math, no Pallas) for correctness checks
# ----------------------------------------------------------------------------
def _ref_loss(x, target, one_best, soft_target, soft_entropy, w, padding_idx,
              smoothing, normalize_length=False,
              soft_stream_dtype=jnp.bfloat16):
    B, S, V = x.shape
    xf = x.reshape(-1, V).astype(jnp.float32)
    logp = jax.nn.log_softmax(xf, axis=-1)
    xlogy = jax.scipy.special.xlogy

    tgt = target.reshape(-1) if target is not None else None
    denom = jnp.float32(B)
    hard_loss = None
    if w != 1.0 or normalize_length:
        ig_h = tgt == padding_idx
        if normalize_length:
            denom = jnp.sum(~ig_h).astype(jnp.float32)
    if w != 1.0:
        tgt_m = jnp.where(ig_h, 0, tgt)
        conf = 1.0 - smoothing
        low = smoothing / (V - 1)
        td = jnp.full(xf.shape, low, jnp.float32)
        td = td.at[jnp.arange(xf.shape[0]), tgt_m].set(conf)
        kl_h = jnp.where(ig_h[:, None], 0.0, xlogy(td, td) - td * logp)
        hard_loss = kl_h.sum() / denom
        if w == 0.0:
            return hard_loss

    st = soft_target.reshape(-1, V)
    if soft_stream_dtype is not None:
        st = st.astype(soft_stream_dtype)
    st = st.astype(jnp.float32)
    if soft_entropy is None:
        sf32 = soft_target.reshape(-1, V).astype(jnp.float32)
        ent = jnp.sum(xlogy(sf32, sf32), axis=-1)
    else:
        ent = soft_entropy.reshape(-1).astype(jnp.float32)
    ig_s = one_best.reshape(-1) == padding_idx
    kl_s_rows = ent - jnp.sum(st * logp, axis=-1)
    soft_loss = jnp.where(ig_s, 0.0, kl_s_rows).sum() / denom
    if w == 1.0:
        return soft_loss
    return (1.0 - w) * hard_loss + w * soft_loss


if __name__ == "__main__":
    # Small shapes consistent with the module: x (batch, seqlen, vocab)
    B, S, V = 2, 8, 256
    padding_idx = -1
    smoothing = 0.1

    key = jax.random.PRNGKey(0)
    (kx, kt, ks0, ks1, kh0, kh1, kx2, kt2,
     kx3, kt3, ks3, kb3) = jax.random.split(key, 12)

    x = jax.random.normal(kx, (B, S, V), jnp.float32)

    # hard targets, with some padded positions (= padding_idx)
    target = jax.random.randint(kt, (B, S), 1, V).astype(jnp.int32)
    target = target.at[1, 6:].set(padding_idx)

    # synthetic n-best hypotheses + per-token score lists (ragged lengths:
    # one shorter than seqlen, one longer, to exercise both padding branches)
    lens = [6, 10]
    hyps_list = [
        [{'yseq': [0] + list(np.asarray(
            jax.random.randint(kh0, (lens[0],), 1, V)))}],
        [{'yseq': [0] + list(np.asarray(
            jax.random.randint(kh1, (lens[1],), 1, V)))}],
    ]
    sentences_scores_list = [
        np.asarray(jax.random.normal(ks0, (lens[0], V))).tolist(),
        np.asarray(jax.random.normal(ks1, (lens[1], V))).tolist(),
    ]

    pad_one_best, soft_target, soft_ent = padding_for_softloss(
        S, hyps_list, sentences_scores_list, V)
    pad_one_best = jnp.asarray(pad_one_best)
    soft_target = jnp.asarray(soft_target)
    soft_ent = jnp.asarray(soft_ent)

    # ---------- check 1: mixed weight (both branches active) ----------
    wmix = 0.5
    loss = posterior_based_loss(
        x, target, pad_one_best, soft_target, wmix, soft_entropy=soft_ent,
        padding_idx=padding_idx, smoothing=smoothing, normalize_length=False)
    loss = jax.block_until_ready(loss)
    ref = _ref_loss(x, target, pad_one_best, soft_target, soft_ent, wmix,
                    padding_idx, smoothing, normalize_length=False)
    assert np.isfinite(float(loss))
    np.testing.assert_allclose(float(loss), float(ref), rtol=1e-4, atol=1e-5)
    # loose check vs. exact f32 math (no bf16 soft-target stream)
    ref_f32 = _ref_loss(x, target, pad_one_best, soft_target, soft_ent, wmix,
                        padding_idx, smoothing, normalize_length=False,
                        soft_stream_dtype=None)
    np.testing.assert_allclose(float(loss), float(ref_f32), rtol=1e-2)

    # ---------- check 2: mixed weight, normalize_length=True ----------
    loss_n = posterior_based_loss(
        x, target, pad_one_best, soft_target, wmix, soft_entropy=soft_ent,
        padding_idx=padding_idx, smoothing=smoothing, normalize_length=True)
    loss_n = jax.block_until_ready(loss_n)
    ref_n = _ref_loss(x, target, pad_one_best, soft_target, soft_ent, wmix,
                      padding_idx, smoothing, normalize_length=True)
    np.testing.assert_allclose(float(loss_n), float(ref_n), rtol=1e-4, atol=1e-5)

    # ---------- check 3: w == 1 (soft-only, in-wrapper entropy fallback) -----
    loss_s = posterior_based_loss(
        x, target, pad_one_best, soft_target, 1.0,
        padding_idx=padding_idx, smoothing=smoothing, normalize_length=False)
    loss_s = jax.block_until_ready(loss_s)
    ref_s = _ref_loss(x, target, pad_one_best, soft_target, None, 1.0,
                      padding_idx, smoothing, normalize_length=False)
    np.testing.assert_allclose(float(loss_s), float(ref_s), rtol=1e-4, atol=1e-5)

    # ---------- check 4: w == 0 (hard-only), odd N exercising row padding ----
    B2, S2 = 3, 5
    x2 = jax.random.normal(kx2, (B2, S2, V), jnp.float32)
    target2 = jax.random.randint(kt2, (B2, S2), 1, V).astype(jnp.int32)
    target2 = target2.at[0, 3:].set(padding_idx)
    loss_h = posterior_based_loss(
        x2, target2, None, None, 0.0,
        padding_idx=padding_idx, smoothing=smoothing, normalize_length=False)
    loss_h = jax.block_until_ready(loss_h)
    ref_h = _ref_loss(x2, target2, None, None, None, 0.0,
                      padding_idx, smoothing, normalize_length=False)
    np.testing.assert_allclose(float(loss_h), float(ref_h), rtol=1e-4, atol=1e-5)

    # ---------- check 5: forced vocab-split online path (V % 128 != 0) ------
    B3, S3, V3 = 2, 4, 200
    x3 = jax.random.normal(kx3, (B3, S3, V3), jnp.float32)
    target3 = jax.random.randint(kt3, (B3, S3), 1, V3).astype(jnp.int32)
    target3 = target3.at[0, 2:].set(padding_idx)
    soft3 = jax.nn.softmax(
        jax.random.normal(ks3, (B3, S3, V3), jnp.float32), axis=-1)
    onebest3 = jax.random.randint(kb3, (B3, S3), 1, V3).astype(jnp.int32)
    onebest3 = onebest3.at[1, 3:].set(padding_idx)
    ent3 = jnp.sum(jax.scipy.special.xlogy(soft3, soft3), axis=-1)
    loss5 = posterior_based_loss(
        x3, target3, onebest3, soft3, 0.3, soft_entropy=ent3,
        padding_idx=padding_idx, smoothing=smoothing, normalize_length=False,
        row_tile=16, v_tile=128)
    loss5 = jax.block_until_ready(loss5)
    ref5 = _ref_loss(x3, target3, onebest3, soft3, ent3, 0.3,
                     padding_idx, smoothing, normalize_length=False)
    np.testing.assert_allclose(float(loss5), float(ref5), rtol=1e-4, atol=1e-5)

    print("KERNEL_OK")
</pallas_src>

<mosaic_0001>
module attributes {stable_mosaic.version = 11 : i64} {
  func.func @_posterior_loss_kernel(%arg0: i32, %arg1: i32, %arg2: i32, %arg3: memref<16x256xf32, #tpu.memory_space<vmem>>, %arg4: memref<16x2xi32, #tpu.memory_space<vmem>>, %arg5: memref<16x256xbf16, #tpu.memory_space<vmem>>, %arg6: memref<16x1xf32, #tpu.memory_space<vmem>>, %arg7: memref<1x8x128xf32, #tpu.memory_space<vmem>>, %arg8: memref<1x8x128xf32, #tpu.memory_space<vmem>>, %arg9: memref<16x1xf32, #tpu.memory_space<vmem>>, %arg10: memref<16x1xf32, #tpu.memory_space<vmem>>, %arg11: memref<16x1xf32, #tpu.memory_space<vmem>>, %arg12: memref<16x1xf32, #tpu.memory_space<vmem>>, %arg13: memref<16x1xf32, #tpu.memory_space<vmem>>, %arg14: memref<16x1xf32, #tpu.memory_space<vmem>>, %arg15: memref<16x1xf32, #tpu.memory_space<vmem>>) attributes {dimension_semantics = [#tpu.dimension_semantics<arbitrary>, #tpu.dimension_semantics<arbitrary>, #tpu.dimension_semantics<arbitrary>], iteration_bounds = array<i64: 1, 1, 1>, scalar_prefetch = 0 : i64, scratch_operands = 7 : i64, tpu.core_type = #tpu.core_type<tc>, window_params = [{transform_indices = @transform_0, window_bounds = array<i64: 16, 256>}, {transform_indices = @transform_1, window_bounds = array<i64: 16, 2>}, {transform_indices = @transform_2, window_bounds = array<i64: 16, 256>}, {transform_indices = @transform_3, window_bounds = array<i64: 16, 1>}, {transform_indices = @transform_4, window_bounds = array<i64: 1, 8, 128>}, {transform_indices = @transform_5, window_bounds = array<i64: 1, 8, 128>}]} {
    %c0_i32 = arith.constant 0 : i32
    %0 = arith.cmpi eq, %arg1, %c0_i32 : i32
    %c0_i32_0 = arith.constant 0 : i32
    %1 = arith.cmpi eq, %arg2, %c0_i32_0 : i32
    %2 = arith.andi %0, %1 : i1
    %3 = arith.extui %2 : i1 to i32
    %c0_i32_1 = arith.constant 0 : i32
    %4 = arith.cmpi ne, %3, %c0_i32_1 : i32
    scf.if %4 {
      %cst_41 = arith.constant 0.000000e+00 : f32
      %66 = vector.broadcast %cst_41 : f32 to vector<16x1xf32>
      %c0_42 = arith.constant 0 : index
      %c0_43 = arith.constant 0 : index
      %67 = vector.load %arg9[%c0_42, %c0_43] : memref<16x1xf32, #tpu.memory_space<vmem>>, vector<16x1xf32>
      tpu.vector_store %arg9[%c0_42, %c0_43], %66 {strides = array<i32>} : memref<16x1xf32, #tpu.memory_space<vmem>>, vector<16x1xf32>,
      %cst_44 = arith.constant 0.000000e+00 : f32
      %68 = vector.broadcast %cst_44 : f32 to vector<16x1xf32>
      %c0_45 = arith.constant 0 : index
      %c0_46 = arith.constant 0 : index
      %69 = vector.load %arg10[%c0_45, %c0_46] : memref<16x1xf32, #tpu.memory_space<vmem>>, vector<16x1xf32>
      tpu.vector_store %arg10[%c0_45, %c0_46], %68 {strides = array<i32>} : memref<16x1xf32, #tpu.memory_space<vmem>>, vector<16x1xf32>,
    } else {
    }
    %c0_i32_2 = arith.constant 0 : i32
    %5 = arith.cmpi eq, %arg2, %c0_i32_2 : i32
    %6 = arith.extui %5 : i1 to i32
    %c0_i32_3 = arith.constant 0 : i32
    %7 = arith.cmpi ne, %6, %c0_i32_3 : i32
    scf.if %7 {
      %cst_41 = arith.constant -1.000000e+30 : f32
      %66 = vector.broadcast %cst_41 : f32 to vector<16x1xf32>
      %c0_42 = arith.constant 0 : index
      %c0_43 = arith.constant 0 : index
      %67 = vector.load %arg11[%c0_42, %c0_43] : memref<16x1xf32, #tpu.memory_space<vmem>>, vector<16x1xf32>
      tpu.vector_store %arg11[%c0_42, %c0_43], %66 {strides = array<i32>} : memref<16x1xf32, #tpu.memory_space<vmem>>, vector<16x1xf32>,
      %cst_44 = arith.constant 0.000000e+00 : f32
      %68 = vector.broadcast %cst_44 : f32 to vector<16x1xf32>
      %c0_45 = arith.constant 0 : index
      %c0_46 = arith.constant 0 : index
      %69 = vector.load %arg12[%c0_45, %c0_46] : memref<16x1xf32, #tpu.memory_space<vmem>>, vector<16x1xf32>
      tpu.vector_store %arg12[%c0_45, %c0_46], %68 {strides = array<i32>} : memref<16x1xf32, #tpu.memory_space<vmem>>, vector<16x1xf32>,
      %cst_47 = arith.constant 0.000000e+00 : f32
      %70 = vector.broadcast %cst_47 : f32 to vector<16x1xf32>
      %c0_48 = arith.constant 0 : index
      %c0_49 = arith.constant 0 : index
      %71 = vector.load %arg13[%c0_48, %c0_49] : memref<16x1xf32, #tpu.memory_space<vmem>>, vector<16x1xf32>
      tpu.vector_store %arg13[%c0_48, %c0_49], %70 {strides = array<i32>} : memref<16x1xf32, #tpu.memory_space<vmem>>, vector<16x1xf32>,
      %cst_50 = arith.constant 0.000000e+00 : f32
      %72 = vector.broadcast %cst_50 : f32 to vector<16x1xf32>
      %c0_51 = arith.constant 0 : index
      %c0_52 = arith.constant 0 : index
      %73 = vector.load %arg14[%c0_51, %c0_52] : memref<16x1xf32, #tpu.memory_space<vmem>>, vector<16x1xf32>
      tpu.vector_store %arg14[%c0_51, %c0_52], %72 {strides = array<i32>} : memref<16x1xf32, #tpu.memory_space<vmem>>, vector<16x1xf32>,
      %cst_53 = arith.constant 0.000000e+00 : f32
      %74 = vector.broadcast %cst_53 : f32 to vector<16x1xf32>
      %c0_54 = arith.constant 0 : index
      %c0_55 = arith.constant 0 : index
      %75 = vector.load %arg15[%c0_54, %c0_55] : memref<16x1xf32, #tpu.memory_space<vmem>>, vector<16x1xf32>
      tpu.vector_store %arg15[%c0_54, %c0_55], %74 {strides = array<i32>} : memref<16x1xf32, #tpu.memory_space<vmem>>, vector<16x1xf32>,
    } else {
    }
    %c0 = arith.constant 0 : index
    %c0_4 = arith.constant 0 : index
    %8 = vector.load %arg3[%c0, %c0_4] : memref<16x256xf32, #tpu.memory_space<vmem>>, vector<16x256xf32>
    %c0_5 = arith.constant 0 : index
    %c0_6 = arith.constant 0 : index
    %9 = vector.load %arg11[%c0_5, %c0_6] : memref<16x1xf32, #tpu.memory_space<vmem>>, vector<16x1xf32>
    %cst = arith.constant dense<0xFF800000> : vector<16xf32>
    %10 = vector.multi_reduction <maximumf>, %8, %cst [1] : vector<16x256xf32> to vector<16xf32>
    %11 = vector.shape_cast %10 : vector<16xf32> to vector<16x1xf32>
    %12 = arith.maximumf %9, %11 : vector<16x1xf32>
    %c0_7 = arith.constant 0 : index
    %c0_8 = arith.constant 0 : index
    %13 = vector.load %arg12[%c0_7, %c0_8] : memref<16x1xf32, #tpu.memory_space<vmem>>, vector<16x1xf32>
    %14 = arith.subf %9, %12 : vector<16x1xf32>
    %15 = math.exp %14 : vector<16x1xf32>
    %16 = arith.mulf %13, %15 : vector<16x1xf32>
    %17 = vector.broadcast %12 : vector<16x1xf32> to vector<16x256xf32>
    %18 = arith.subf %8, %17 : vector<16x256xf32>
    %19 = math.exp %18 : vector<16x256xf32>
    %cst_9 = arith.constant dense<0.000000e+00> : vector<16xf32>
    %20 = vector.multi_reduction <add>, %19, %cst_9 [1] : vector<16x256xf32> to vector<16xf32>
    %21 = vector.shape_cast %20 : vector<16xf32> to vector<16x1xf32>
    %22 = arith.addf %16, %21 : vector<16x1xf32>
    %c0_10 = arith.constant 0 : index
    %c0_11 = arith.constant 0 : index
    %23 = vector.load %arg12[%c0_10, %c0_11] : memref<16x1xf32, #tpu.memory_space<vmem>>, vector<16x1xf32>
    tpu.vector_store %arg12[%c0_10, %c0_11], %22 {strides = array<i32>} : memref<16x1xf32, #tpu.memory_space<vmem>>, vector<16x1xf32>,
    %c0_12 = arith.constant 0 : index
    %c0_13 = arith.constant 0 : index
    %24 = vector.load %arg11[%c0_12, %c0_13] : memref<16x1xf32, #tpu.memory_space<vmem>>, vector<16x1xf32>
    tpu.vector_store %arg11[%c0_12, %c0_13], %12 {strides = array<i32>} : memref<16x1xf32, #tpu.memory_space<vmem>>, vector<16x1xf32>,
    %c256_i32 = arith.constant 256 : i32
    %25 = arith.muli %arg2, %c256_i32 : i32
    %26 = tpu.iota {dimensions = array<i32: 1>} : vector<16x256xi32>
    %27 = vector.broadcast %25 : i32 to vector<16x256xi32>
    %28 = arith.addi %27, %26 : vector<16x256xi32>
    %c0_14 = arith.constant 0 : index
    %c0_15 = arith.constant 0 : index
    %29 = vector.load %arg4[%c0_14, %c0_15] : memref<16x2xi32, #tpu.memory_space<vmem>>, vector<16x1xi32>
    %c-1_i32 = arith.constant -1 : i32
    %30 = vector.broadcast %c-1_i32 : i32 to vector<16x1xi32>
    %31 = arith.cmpi eq, %29, %30 : vector<16x1xi32>
    %c0_i32_16 = arith.constant 0 : i32
    %32 = vector.broadcast %c0_i32_16 : i32 to vector<16x1xi32>
    %33 = arith.select %31, %32, %29 : vector<16x1xi1>, vector<16x1xi32>
    %34 = vector.broadcast %33 : vector<16x1xi32> to vector<16x256xi32>
    %35 = arith.cmpi eq, %28, %34 : vector<16x256xi32>
    %cst_17 = arith.constant 0.899999976 : f32
    %cst_18 = arith.constant 3.92156857E-4 : f32
    %36 = vector.broadcast %cst_17 : f32 to vector<16x256xf32>
    %37 = vector.broadcast %cst_18 : f32 to vector<16x256xf32>
    %38 = arith.select %35, %36, %37 : vector<16x256xi1>, vector<16x256xf32>
    %c0_19 = arith.constant 0 : index
    %c0_20 = arith.constant 0 : index
    %39 = vector.load %arg13[%c0_19, %c0_20] : memref<16x1xf32, #tpu.memory_space<vmem>>, vector<16x1xf32>
    %40 = arith.mulf %38, %8 : vector<16x256xf32>
    %cst_21 = arith.constant dense<0.000000e+00> : vector<16xf32>
    %41 = vector.multi_reduction <add>, %40, %cst_21 [1] : vector<16x256xf32> to vector<16xf32>
    %42 = vector.shape_cast %41 : vector<16xf32> to vector<16x1xf32>
    %43 = arith.addf %39, %42 : vector<16x1xf32>
    %c0_22 = arith.constant 0 : index
    %c0_23 = arith.constant 0 : index
    %44 = vector.load %arg13[%c0_22, %c0_23] : memref<16x1xf32, #tpu.memory_space<vmem>>, vector<16x1xf32>
    tpu.vector_store %arg13[%c0_22, %c0_23], %43 {strides = array<i32>} : memref<16x1xf32, #tpu.memory_space<vmem>>, vector<16x1xf32>,
    %c0_24 = arith.constant 0 : index
    %c0_25 = arith.constant 0 : index
    %45 = vector.load %arg5[%c0_24, %c0_25] : memref<16x256xbf16, #tpu.memory_space<vmem>>, vector<16x256xbf16>
    %46 = arith.extf %45 : vector<16x256xbf16> to vector<16x256xf32>
    %c0_26 = arith.constant 0 : index
    %c0_27 = arith.constant 0 : index
    %47 = vector.load %arg14[%c0_26, %c0_27] : memref<16x1xf32, #tpu.memory_space<vmem>>, vector<16x1xf32>
    %48 = arith.mulf %46, %8 : vector<16x256xf32>
    %cst_28 = arith.constant dense<0.000000e+00> : vector<16xf32>
    %49 = vector.multi_reduction <add>, %48, %cst_28 [1] : vector<16x256xf32> to vector<16xf32>
    %50 = vector.shape_cast %49 : vector<16xf32> to vector<16x1xf32>
    %51 = arith.addf %47, %50 : vector<16x1xf32>
    %c0_29 = arith.constant 0 : index
    %c0_30 = arith.constant 0 : index
    %52 = vector.load %arg14[%c0_29, %c0_30] : memref<16x1xf32, #tpu.memory_space<vmem>>, vector<16x1xf32>
    tpu.vector_store %arg14[%c0_29, %c0_30], %51 {strides = array<i32>} : memref<16x1xf32, #tpu.memory_space<vmem>>, vector<16x1xf32>,
    %c0_31 = arith.constant 0 : index
    %c0_32 = arith.constant 0 : index
    %53 = vector.load %arg15[%c0_31, %c0_32] : memref<16x1xf32, #tpu.memory_space<vmem>>, vector<16x1xf32>
    %cst_33 = arith.constant dense<0.000000e+00> : vector<16xf32>
    %54 = vector.multi_reduction <add>, %46, %cst_33 [1] : vector<16x256xf32> to vector<16xf32>
    %55 = vector.shape_cast %54 : vector<16xf32> to vector<16x1xf32>
    %56 = arith.addf %53, %55 : vector<16x1xf32>
    %c0_34 = arith.constant 0 : index
    %c0_35 = arith.constant 0 : index
    %57 = vector.load %arg15[%c0_34, %c0_35] : memref<16x1xf32, #tpu.memory_space<vmem>>, vector<16x1xf32>
    tpu.vector_store %arg15[%c0_34, %c0_35], %56 {strides = array<i32>} : memref<16x1xf32, #tpu.memory_space<vmem>>, vector<16x1xf32>,
    %c0_i32_36 = arith.constant 0 : i32
    %58 = arith.cmpi eq, %arg2, %c0_i32_36 : i32
    %59 = arith.extui %58 : i1 to i32
    %c0_i32_37 = arith.constant 0 : i32
    %60 = arith.cmpi ne, %59, %c0_i32_37 : i32
    scf.if %60 {
      %c0_41 = arith.constant 0 : index
      %c0_42 = arith.constant 0 : index
      %66 = vector.load %arg11[%c0_41, %c0_42] : memref<16x1xf32, #tpu.memory_space<vmem>>, vector<16x1xf32>
      %c0_43 = arith.constant 0 : index
      %c0_44 = arith.constant 0 : index
      %67 = vector.load %arg12[%c0_43, %c0_44] : memref<16x1xf32, #tpu.memory_space<vmem>>, vector<16x1xf32>
      %68 = math.log %67 : vector<16x1xf32>
      %69 = arith.addf %66, %68 : vector<16x1xf32>
      %c0_45 = arith.constant 0 : index
      %c0_46 = arith.constant 0 : index
      %70 = vector.load %arg4[%c0_45, %c0_46] : memref<16x2xi32, #tpu.memory_space<vmem>>, vector<16x1xi32>
      %c-1_i32_47 = arith.constant -1 : i32
      %71 = vector.broadcast %c-1_i32_47 : i32 to vector<16x1xi32>
      %72 = arith.cmpi eq, %70, %71 : vector<16x1xi32>
      %c0_48 = arith.constant 0 : index
      %c0_49 = arith.constant 0 : index
      %73 = vector.load %arg13[%c0_48, %c0_49] : memref<16x1xf32, #tpu.memory_space<vmem>>, vector<16x1xf32>
      %cst_50 = arith.constant -0.879209339 : f32
      %74 = vector.broadcast %cst_50 : f32 to vector<16x1xf32>
      %75 = arith.subf %74, %73 : vector<16x1xf32>
      %76 = arith.addf %75, %69 : vector<16x1xf32>
      %c0_51 = arith.constant 0 : index
      %c0_52 = arith.constant 0 : index
      %77 = vector.load %arg9[%c0_51, %c0_52] : memref<16x1xf32, #tpu.memory_space<vmem>>, vector<16x1xf32>
      %cst_53 = arith.constant 0.000000e+00 : f32
      %78 = vector.broadcast %cst_53 : f32 to vector<16x1xf32>
      %79 = arith.select %72, %78, %76 : vector<16x1xi1>, vector<16x1xf32>
      %80 = arith.addf %77, %79 : vector<16x1xf32>
      %c0_54 = arith.constant 0 : index
      %c0_55 = arith.constant 0 : index
      %81 = vector.load %arg9[%c0_54, %c0_55] : memref<16x1xf32, #tpu.memory_space<vmem>>, vector<16x1xf32>
      tpu.vector_store %arg9[%c0_54, %c0_55], %80 {strides = array<i32>} : memref<16x1xf32, #tpu.memory_space<vmem>>, vector<16x1xf32>,
      %c0_56 = arith.constant 0 : index
      %c1 = arith.constant 1 : index
      %82 = vector.load %arg4[%c0_56, %c1] : memref<16x2xi32, #tpu.memory_space<vmem>>, vector<16x1xi32>
      %c-1_i32_57 = arith.constant -1 : i32
      %83 = vector.broadcast %c-1_i32_57 : i32 to vector<16x1xi32>
      %84 = arith.cmpi eq, %82, %83 : vector<16x1xi32>
      %c0_58 = arith.constant 0 : index
      %c0_59 = arith.constant 0 : index
      %85 = vector.load %arg6[%c0_58, %c0_59] : memref<16x1xf32, #tpu.memory_space<vmem>>, vector<16x1xf32>
      %c0_60 = arith.constant 0 : index
      %c0_61 = arith.constant 0 : index
      %86 = vector.load %arg14[%c0_60, %c0_61] : memref<16x1xf32, #tpu.memory_space<vmem>>, vector<16x1xf32>
      %87 = arith.subf %85, %86 : vector<16x1xf32>
      %c0_62 = arith.constant 0 : index
      %c0_63 = arith.constant 0 : index
      %88 = vector.load %arg15[%c0_62, %c0_63] : memref<16x1xf32, #tpu.memory_space<vmem>>, vector<16x1xf32>
      %89 = arith.mulf %69, %88 : vector<16x1xf32>
      %90 = arith.addf %87, %89 : vector<16x1xf32>
      %c0_64 = arith.constant 0 : index
      %c0_65 = arith.constant 0 : index
      %91 = vector.load %arg10[%c0_64, %c0_65] : memref<16x1xf32, #tpu.memory_space<vmem>>, vector<16x1xf32>
      %cst_66 = arith.constant 0.000000e+00 : f32
      %92 = vector.broadcast %cst_66 : f32 to vector<16x1xf32>
      %93 = arith.select %84, %92, %90 : vector<16x1xi1>, vector<16x1xf32>
      %94 = arith.addf %91, %93 : vector<16x1xf32>
      %c0_67 = arith.constant 0 : index
      %c0_68 = arith.constant 0 : index
      %95 = vector.load %arg10[%c0_67, %c0_68] : memref<16x1xf32, #tpu.memory_space<vmem>>, vector<16x1xf32>
      tpu.vector_store %arg10[%c0_67, %c0_68], %94 {strides = array<i32>} : memref<16x1xf32, #tpu.memory_space<vmem>>, vector<16x1xf32>,
    } else {
    }
    %c0_i32_38 = arith.constant 0 : i32
    %61 = arith.cmpi eq, %arg1, %c0_i32_38 : i32
    %c0_i32_39 = arith.constant 0 : i32
    %62 = arith.cmpi eq, %arg2, %c0_i32_39 : i32
    %63 = arith.andi %61, %62 : i1
    %64 = arith.extui %63 : i1 to i32
    %c0_i32_40 = arith.constant 0 : i32
    %65 = arith.cmpi ne, %64, %c0_i32_40 : i32
    scf.if %65 {
      %c0_41 = arith.constant 0 : index
      %c0_42 = arith.constant 0 : index
      %66 = vector.load %arg9[%c0_41, %c0_42] : memref<16x1xf32, #tpu.memory_space<vmem>>, vector<16x1xf32>
      %67 = vector.shape_cast %66 : vector<16x1xf32> to vector<1x16x1xf32>
      %cst_43 = arith.constant dense<0.000000e+00> : vector<1xf32>
      %68 = vector.multi_reduction <add>, %67, %cst_43 [1, 2] : vector<1x16x1xf32> to vector<1xf32>
      %69 = vector.shape_cast %68 : vector<1xf32> to vector<1x1x1xf32>
      %70 = vector.extract %69[0, 0, 0] : f32 from vector<1x1x1xf32>
      %71 = vector.broadcast %70 : f32 to vector<1x8x128xf32>
      %c0_44 = arith.constant 0 : index
      %c0_45 = arith.constant 0 : index
      %c0_46 = arith.constant 0 : index
      %72 = vector.load %arg7[%c0_44, %c0_45, %c0_46] : memref<1x8x128xf32, #tpu.memory_space<vmem>>, vector<1x8x128xf32>
      tpu.vector_store %arg7[%c0_44, %c0_45, %c0_46], %71 {strides = array<i32>} : memref<1x8x128xf32, #tpu.memory_space<vmem>>, vector<1x8x128xf32>,
      %c0_47 = arith.constant 0 : index
      %c0_48 = arith.constant 0 : index
      %73 = vector.load %arg10[%c0_47, %c0_48] : memref<16x1xf32, #tpu.memory_space<vmem>>, vector<16x1xf32>
      %74 = vector.shape_cast %73 : vector<16x1xf32> to vector<1x16x1xf32>
      %cst_49 = arith.constant dense<0.000000e+00> : vector<1xf32>
      %75 = vector.multi_reduction <add>, %74, %cst_49 [1, 2] : vector<1x16x1xf32> to vector<1xf32>
      %76 = vector.shape_cast %75 : vector<1xf32> to vector<1x1x1xf32>
      %77 = vector.extract %76[0, 0, 0] : f32 from vector<1x1x1xf32>
      %78 = vector.broadcast %77 : f32 to vector<1x8x128xf32>
      %c0_50 = arith.constant 0 : index
      %c0_51 = arith.constant 0 : index
      %c0_52 = arith.constant 0 : index
      %79 = vector.load %arg8[%c0_50, %c0_51, %c0_52] : memref<1x8x128xf32, #tpu.memory_space<vmem>>, vector<1x8x128xf32>
      tpu.vector_store %arg8[%c0_50, %c0_51, %c0_52], %78 {strides = array<i32>} : memref<1x8x128xf32, #tpu.memory_space<vmem>>, vector<1x8x128xf32>,
    } else {
    }
    return
  }
  func.func @transform_0(%arg0: i32, %arg1: i32, %arg2: i32) -> (i32, i32) {
    %c1_i32 = arith.constant 1 : i32
    %0 = arith.muli %arg0, %c1_i32 : i32
    %1 = arith.addi %0, %arg1 : i32
    %c0_i32 = arith.constant 0 : i32
    return %1, %arg2 : i32, i32
  }
  func.func @transform_1(%arg0: i32, %arg1: i32, %arg2: i32) -> (i32, i32) {
    %c1_i32 = arith.constant 1 : i32
    %0 = arith.muli %arg0, %c1_i32 : i32
    %1 = arith.addi %0, %arg1 : i32
    %c0_i32 = arith.constant 0 : i32
    %c0_i32_0 = arith.constant 0 : i32
    return %1, %c0_i32 : i32, i32
  }
  func.func @transform_2(%arg0: i32, %arg1: i32, %arg2: i32) -> (i32, i32) {
    %c1_i32 = arith.constant 1 : i32
    %0 = arith.muli %arg0, %c1_i32 : i32
    %1 = arith.addi %0, %arg1 : i32
    %c0_i32 = arith.constant 0 : i32
    return %1, %arg2 : i32, i32
  }
  func.func @transform_3(%arg0: i32, %arg1: i32, %arg2: i32) -> (i32, i32) {
    %c1_i32 = arith.constant 1 : i32
    %0 = arith.muli %arg0, %c1_i32 : i32
    %1 = arith.addi %0, %arg1 : i32
    %c0_i32 = arith.constant 0 : i32
    %c0_i32_0 = arith.constant 0 : i32
    return %1, %c0_i32 : i32, i32
  }
  func.func @transform_4(%arg0: i32, %arg1: i32, %arg2: i32) -> (i32, i32, i32) {
    %c0_i32 = arith.constant 0 : i32
    %c0_i32_0 = arith.constant 0 : i32
    %c0_i32_1 = arith.constant 0 : i32
    return %arg0, %c0_i32, %c0_i32_0 : i32, i32, i32
  }
  func.func @transform_5(%arg0: i32, %arg1: i32, %arg2: i32) -> (i32, i32, i32) {
    %c0_i32 = arith.constant 0 : i32
    %c0_i32_0 = arith.constant 0 : i32
    %c0_i32_1 = arith.constant 0 : i32
    return %arg0, %c0_i32, %c0_i32_0 : i32, i32, i32
  }
}

</mosaic_0001>

<bundles_post_ra>
// kernel: tpu_custom_call.1
= control target key start
LH: loop header
LB: loop body
LE: loop exit
PB: predicated region body
PF: predicated region fallthrough
CT: control target
= control target key end

     0   :  { %11 = vsyncpa [#allocation10], 0  ;;  %s708_s0 = inlined_call_operand.vmem [shape: f32[16,256], index: 0, kind: input, shape index: {}]   ;;  %s709_s1 = inlined_call_operand.vmem [shape: s32[16,2], index: 1, kind: input, shape index: {}]   ;;  %s710_s2 = inlined_call_operand.hbm [shape: bf16[16,256], index: 2, kind: input, shape index: {}]   ;;  %s711_s3 = inlined_call_operand.vmem [shape: f32[16,1], index: 3, kind: input, shape index: {}]   ;;  %s712_s4 = inlined_call_operand.hbm [shape: f32[1,8,128], index: 4, kind: output, shape index: {0}]   ;;  %s713_s5 = inlined_call_operand.hbm [shape: f32[1,8,128], index: 5, kind: output, shape index: {1}]  }
   0x1   :  { %12 = vsyncpa [#allocation11], 0 }
   0x2   :  { %13 = vsyncpa [#allocation14], 0  ;;  %s44_s20 = sshll.u32 %s710_s2, 4  ;;  %s542_s21 = smov [#allocation9]   ;;  %s45_s20 = int_to_ptr.hbm [resolvable:$true] %s44_s20 }
   0x3   :  { %s46_s22 = sshll.u32 %s542_s21, 4  ;;  %s543_s23 = smov 128   ;;  %s47_s22 = int_to_ptr.vmem [resolvable:$true] %s46_s22 }
   0x4   :  { %s544_s24 = smov 8  }
   0x5   :  { %52 = dma.hbm_to_vmem [thread:$0]  %s45_s20, 256, %s47_s22, [#allocation10], %s543_s23, %s543_s23, %s544_s24  }
   0x6   :  { %536 = dma.done.wait [#allocation10], 256  }
   0x7   :  { %537 = vsyncadd [#allocation10], 4294967040  ;;  %vm119_vm0 = vcmask 7168   ;;  %v545_v0 = vmov -1e+30   ;;  %v591_v1 = vld [vmem:[%s708_s0] sm:$0xff] }
   0x8   :  { %128 = vst.msk [vmem:[#allocation4] sm:$0xff] %vm119_vm0, %v545_v0  ;;  %v596_v2 = vld [vmem:[%s708_s0 + $0x8] sm:$0xff]  ;;  %v603_v4 = vld [vmem:[%s708_s0 + $0x10] sm:$0xff]  ;;  %v608_v5 = vld [vmem:[%s708_s0 + $0x18] sm:$0xff]  ;;  %v546_v7 = vmov 0   ;;  %v547_v8 = vmov 0.0  }
   0x9   :  { %129 = vst.msk [vmem:[#allocation4 + $0x8] sm:$0xff] %vm119_vm0, %v545_v0  ;;  %v144_v3 = vmax.f32 %v591_v1, %v596_v2  ;;  %v147_v6 = vmax.f32 %v603_v4, %v608_v5  ;;  %445 = vset.pattern.permute.xlu1 %v546_v7  ;;  %446 = vset.pattern.permute.xlu2 %v546_v7  ;;  %v240_v17 = vld [vmem:[#allocation9] sm:$0xff]  ;;  %v241_v23 = vld [vmem:[#allocation9 + $0x8] sm:$0xff]  ;;  %v650_v46 = vld [vmem:[%s709_s1 + $0x8] sm:$0xff]  ;;  %s549_s13 = smov 1   ;;  %s551_s14 = smov [#allocation12]  }
   0xa   :  { %447 = vset.pattern.permute.xlu0 %v546_v7  ;;  %130 = vst.msk [vmem:[#allocation5] sm:$0xff] %vm119_vm0, %v547_v8  ;;  %v242_v18 = vunpack.c.l.bf16 %v240_v17  ;;  %v243_v19 = vunpack.c.h.bf16 %v240_v17  ;;  %v244_v24 = vunpack.c.l.bf16 %v241_v23  ;;  %v245_v25 = vunpack.c.h.bf16 %v241_v23  ;;  %v659_v49 = vld [vmem:[%s709_s1] sm:$0xff]  ;;  %s384_s15 = sshll.u32 %s551_s14, 4  ;;  %s386_s18 = sshll.u32 %s712_s4, 4  ;;  %s385_s15 = int_to_ptr.vmem [resolvable:$true] %s384_s15  ;;  %s387_s18 = int_to_ptr.hbm [resolvable:$true] %s386_s18 }
   0xb   :  { %145 = vmax.xlane.f32.xlu0 %v144_v3  ;;  %120 = vst.msk [vmem:[#allocation2] sm:$0xff] %vm119_vm0, %v547_v8  ;;  %vm207_vm1 = vcmp.eq.s32.totalorder %v650_v46, 4294967295  ;;  %vm206_vm2 = vcmp.eq.s32.totalorder %v659_v49, 4294967295  ;;  %s552_s20 = smov [#allocation13]   ;;  %s397_s24 = sshll.u32 %s713_s5, 4  ;;  %s398_s24 = int_to_ptr.hbm [resolvable:$true] %s397_s24 }
   0xc   :  { %121 = vst.msk [vmem:[#allocation2 + $0x8] sm:$0xff] %vm119_vm0, %v547_v8  ;;  %v248_v20 = vmul.f32 %v242_v18, %v591_v1  ;;  %v249_v21 = vmul.f32 %v243_v19, %v596_v2  ;;  %v250_v26 = vmul.f32 %v244_v24, %v603_v4  ;;  %v251_v27 = vmul.f32 %v245_v25, %v608_v5  ;;  %s395_s21 = sshll.u32 %s552_s20, 4  ;;  %s396_s21 = int_to_ptr.vmem [resolvable:$true] %s395_s21 }
   0xd   :  { %122 = vst.msk [vmem:[#allocation3] sm:$0xff] %vm119_vm0, %v547_v8  ;;  %v267_v28 = vadd.f32 %v245_v25, %v244_v24  ;;  %v209_v47 = vsel %vm207_vm1, 0, %v650_v46  ;;  %v264_v48 = vadd.f32 %v243_v19, %v242_v18  ;;  %v208_v50 = vsel %vm206_vm2, 0, %v659_v49 }
   0xe   :  { %123 = vst.msk [vmem:[#allocation3 + $0x8] sm:$0xff] %vm119_vm0, %v547_v8  ;;  %v252_v22 = vadd.f32 %v249_v21, %v248_v20  ;;  %v255_v30 = vadd.f32 %v251_v27, %v250_v26 }
   0xf   :  { %131 = vst.msk [vmem:[#allocation5 + $0x8] sm:$0xff] %vm119_vm0, %v547_v8  ;;  %v624_v9 = vld [vmem:[#allocation4] sm:$0xff] }
  0x10   :  { %132 = vst.msk [vmem:[#allocation6] sm:$0xff] %vm119_vm0, %v547_v8  ;;  %v629_v13 = vld [vmem:[#allocation4 + $0x8] sm:$0xff] }
  0x11   :  { %133 = vst.msk [vmem:[#allocation6 + $0x8] sm:$0xff] %vm119_vm0, %v547_v8  ;;  %v152_v63 = vld [vmem:[#allocation5] sm:$0xff] }
  0x12   :  { %134 = vst.msk [vmem:[#allocation7] sm:$0xff] %vm119_vm0, %v547_v8 }
  0x13   :  { %148 = vmax.xlane.f32.xlu0 %v147_v6  ;;  %135 = vst.msk [vmem:[#allocation7 + $0x8] sm:$0xff] %vm119_vm0, %v547_v8 }
  0x14   :  { %136 = vst.msk [vmem:[#allocation8] sm:$0xff] %vm119_vm0, %v547_v8 }
  0x15   :  { %137 = vst.msk [vmem:[#allocation8 + $0x8] sm:$0xff] %vm119_vm0, %v547_v8 }
  0x16   :  { %v153_v8 = vld [vmem:[#allocation5 + $0x8] sm:$0xff] }
  0x19   :  { %v246_v52 = vld [vmem:[#allocation7] sm:$0xff] }
  0x1a   :  { %v247_v57 = vld [vmem:[#allocation7 + $0x8] sm:$0xff] }
  0x1b   :  { %253 = vadd.xlane.f32.xlu0 %v252_v22  ;;  %v309_v22 = vld [vmem:[%s711_s3] sm:$0xff] }
  0x1c   :  { %v263_v56 = vld [vmem:[#allocation8 + $0x8] sm:$0xff] }
  0x23   :  { %268 = vadd.xlane.f32.xlu0 %v267_v28 }
  0x37   :  { %214 = vperm.xlu0 %447, %v209_v47  }
  0x7e   :  { %v146_v10 = vpop.xlane.xlu0 %145 }
  0x7f   :  { %v150_v11 = vmax.f32 %v624_v9, %v146_v10 }
  0x81   :  { %v154_v12 = vsub.f32 %v624_v9, %v150_v11  ;;  %195 = vst.msk [vmem:[#allocation4] sm:$0xff] %vm119_vm0, %v150_v11  ;;  %164 = vperm.xlu1 %445, %v150_v11  }
  0x83   :  { %v156_v54 = vmul.f32 1.442695, %v154_v12 }
  0x86   :  { %v149_v14 = vpop.xlane.xlu0 %148 }
  0x87   :  { %v632_v15 = vmax.f32 %v629_v13, %v149_v14  ;;  %v198_v14 = vlaneseq }
  0x88   :  { %v277_v25 = vld [vmem:[#allocation4] sm:$0xff] }
  0x89   :  { %v155_v16 = vsub.f32 %v629_v13, %v632_v15  ;;  %196 = vst.msk [vmem:[#allocation4 + $0x8] sm:$0xff] %vm119_vm0, %v632_v15  ;;  %169 = vperm.xlu1 %445, %v632_v15   ;;  %v262_v13 = vld [vmem:[#allocation8] sm:$0xff]  ;;  %v199_v17 = vand.u32 127, %v198_v14 }
  0x8b   :  { %v158_v61 = vmul.f32 1.442695, %v155_v16  ;;  %v200_v20 = vadd.s32 128, %v199_v17 }
  0x8e   :  { %v254_v51 = vpop.xlane.xlu0 %253 }
  0x8f   :  { %v258_v53 = vadd.f32 %v254_v51, %v246_v52 }
  0x91   :  { %260 = vst.msk [vmem:[#allocation7] sm:$0xff] %vm119_vm0, %v258_v53 }
  0x96   :  { %v269_v55 = vpop.xlane.xlu0 %268 }
  0x97   :  { %v271_v59 = vadd.f32 %v269_v55, %v263_v56 }
  0x98   :  { %v311_v23 = vld [vmem:[#allocation7] sm:$0xff] }
  0x99   :  { %273 = vst.msk [vmem:[#allocation8 + $0x8] sm:$0xff] %vm119_vm0, %v271_v59  ;;  %v313_v28 = vsub.f32 %v309_v22, %v311_v23 }
  0xb3   :  { %256 = vadd.xlane.f32.xlu1 %v255_v30 }
  0xf3   :  { %v165_v29 = vpop.permute.xlu1 %164 }
  0xf4   :  { %v172_v31 = vsub.f32 %v591_v1, %v165_v29  ;;  %v173_v32 = vsub.f32 %v596_v2, %v165_v29  ;;  %v548_v29 = vmov 0.00039215686  }
  0xf6   :  { %v176_v33 = vmul.f32 1.442695, %v172_v31  ;;  %v178_v34 = vmul.f32 1.442695, %v173_v32 }
  0xf8   :  { %448 = vpow2.f32 %v176_v33 }
  0xf9   :  { %450 = vpow2.f32 %v178_v34 }
  0xfb   :  { %v170_v35 = vpop.permute.xlu1 %169 }
  0xfc   :  { %v174_v36 = vsub.f32 %v603_v4, %v170_v35  ;;  %v175_v37 = vsub.f32 %v608_v5, %v170_v35 }
  0xfe   :  { %v449_v38 = vpop.eup %448  ;;  %v180_v39 = vmul.f32 1.442695, %v174_v36  ;;  %v182_v40 = vmul.f32 1.442695, %v175_v37  ;;  %v278_v37 = vld [vmem:[#allocation4 + $0x8] sm:$0xff] }
  0xff   :  { %v451_v41 = vpop.eup %450 }
 0x100   :  { %452 = vpow2.f32 %v180_v39  ;;  %v184_v42 = vadd.f32 %v451_v41, %v449_v38  ;;  %v310_v41 = vld [vmem:[%s711_s3 + $0x8] sm:$0xff]  ;;  %s550_s3 = smov 127  }
 0x101   :  { %454 = vpow2.f32 %v182_v40 }
 0x102   :  { %185 = vadd.xlane.f32.xlu2 %v184_v42  ;;  %456 = vpow2.f32 %v156_v54 }
 0x103   :  { %458 = vpow2.f32 %v158_v61  ;;  %v297_v61 = vld [vmem:[#allocation2] sm:$0xff] }
 0x106   :  { %v453_v43 = vpop.eup %452 }
 0x107   :  { %v455_v44 = vpop.eup %454 }
 0x108   :  { %v187_v45 = vadd.f32 %v455_v44, %v453_v43  ;;  %v457_v62 = vpop.eup %456  ;;  %v316_v43 = vld [vmem:[#allocation8 + $0x8] sm:$0xff] }
 0x109   :  { %v160_v0 = vmul.f32 %v457_v62, %v152_v63  ;;  %v459_v7 = vpop.eup %458 }
 0x10a   :  { %188 = vadd.xlane.f32.xlu2 %v187_v45  ;;  %v161_v9 = vmul.f32 %v459_v7, %v153_v8 }
 0x112   :  { %265 = vadd.xlane.f32.xlu2 %v264_v48 }
 0x126   :  { %v257_v58 = vpop.xlane.xlu1 %256 }
 0x127   :  { %v259_v60 = vadd.f32 %v257_v58, %v247_v57  ;;  %v224_v57 = vld [vmem:[#allocation6] sm:$0xff] }
 0x129   :  { %261 = vst.msk [vmem:[#allocation7 + $0x8] sm:$0xff] %vm119_vm0, %v259_v60 }
 0x12a   :  { %211 = vperm.xlu2 %446, %v208_v50  }
 0x130   :  { %v312_v42 = vld [vmem:[#allocation7 + $0x8] sm:$0xff] }
 0x131   :  { %v314_v44 = vsub.f32 %v310_v41, %v312_v42 }
 0x175   :  { %v186_v3 = vpop.xlane.xlu2 %185 }
 0x176   :  { %v190_v6 = vadd.f32 %v186_v3, %v160_v0  ;;  %v225_v0 = vld [vmem:[#allocation6 + $0x8] sm:$0xff] }
 0x178   :  { %193 = vst.msk [vmem:[#allocation5] sm:$0xff] %vm119_vm0, %v190_v6 }
 0x17d   :  { %v189_v10 = vpop.xlane.xlu2 %188 }
 0x17e   :  { %v191_v11 = vadd.f32 %v189_v10, %v161_v9  ;;  %v298_v10 = vld [vmem:[#allocation2 + $0x8] sm:$0xff] }
 0x17f   :  { %v279_v12 = vld [vmem:[#allocation5] sm:$0xff] }
 0x180   :  { %194 = vst.msk [vmem:[#allocation5 + $0x8] sm:$0xff] %vm119_vm0, %v191_v11  ;;  %460 = vlog2.f32 %v279_v12 }
 0x185   :  { %v266_v15 = vpop.xlane.xlu2 %265 }
 0x186   :  { %v270_v16 = vadd.f32 %v266_v15, %v262_v13  ;;  %v461_v18 = vpop.eup %460 }
 0x187   :  { %v280_v19 = vld [vmem:[#allocation5 + $0x8] sm:$0xff]  ;;  %v282_v21 = vmul.f32 0.6931472, %v461_v18 }
 0x188   :  { %272 = vst.msk [vmem:[#allocation8] sm:$0xff] %vm119_vm0, %v270_v16  ;;  %462 = vlog2.f32 %v280_v19 }
 0x189   :  { %v285_v27 = vadd.f32 %v282_v21, %v277_v25 }
 0x18d   :  { %v212_v24 = vpop.permute.xlu2 %211 }
 0x18e   :  { %v463_v26 = vpop.eup %462  ;;  %vm216_vm3 = vcmp.eq.s32.totalorder %v199_v17, %v212_v24  ;;  %vm217_vm4 = vcmp.eq.s32.totalorder %v200_v20, %v212_v24 }
 0x18f   :  { %v220_v30 = vsel %vm216_vm3, 0.9, %v548_v29  ;;  %v221_v31 = vsel %vm217_vm4, 0.9, %v548_v29  ;;  %v315_v32 = vld [vmem:[#allocation8] sm:$0xff] }
 0x190   :  { %v226_v33 = vmul.f32 %v220_v30, %v591_v1  ;;  %v227_v34 = vmul.f32 %v221_v31, %v596_v2  ;;  %v317_v35 = vmul.f32 %v315_v32, %v285_v27  ;;  %v284_v36 = vmul.f32 0.6931472, %v463_v26  ;;  %v215_v2 = vpop.permute.xlu0 %214 }
 0x191   :  { %vm218_vm5 = vcmp.eq.s32.totalorder %v199_v17, %v215_v2  ;;  %vm219_vm6 = vcmp.eq.s32.totalorder %v200_v20, %v215_v2  ;;  %v321_v17 = vld [vmem:[#allocation3] sm:$0xff]  ;;  %v322_v20 = vld [vmem:[#allocation3 + $0x8] sm:$0xff] }
 0x192   :  { %v230_v38 = vadd.f32 %v227_v34, %v226_v33  ;;  %v319_v39 = vadd.f32 %v317_v35, %v313_v28  ;;  %v286_v40 = vadd.f32 %v284_v36, %v278_v37  ;;  %v222_v47 = vsel %vm218_vm5, 0.9, %v548_v29 }
 0x193   :  { %v223_v48 = vsel %vm219_vm6, 0.9, %v548_v29  ;;  %v228_v50 = vmul.f32 %v222_v47, %v603_v4 }
 0x194   :  { %231 = vadd.xlane.f32.xlu1 %v230_v38  ;;  %325 = vrot.lane.b32.xlu2 %v319_v39, %s549_s13  ;;  %v318_v45 = vmul.f32 %v316_v43, %v286_v40  ;;  %v229_v51 = vmul.f32 %v223_v48, %v608_v5 }
 0x196   :  { %v320_v1 = vadd.f32 %v318_v45, %v314_v44  ;;  %v233_v52 = vadd.f32 %v229_v51, %v228_v50 }
 0x19c   :  { %327 = vrot.lane.b32.xlu2 %v320_v1, %s549_s13 }
 0x1c5   :  { %234 = vadd.xlane.f32.xlu2 %v233_v52 }
 0x1ee   :  { %v326_v53 = vpop.permute.xlu2 %325 }
 0x1ef   :  { %v331_v54 = vsel %vm206_vm2, 0.0, %v326_v53 }
 0x1f0   :  { %335 = vrot.lane.b32.xlu1 %v331_v54, %s550_s3 }
 0x1f6   :  { %v328_v55 = vpop.permute.xlu2 %327 }
 0x1f7   :  { %v332_v56 = vsel %vm207_vm1, 0.0, %v328_v55 }
 0x1f8   :  { %337 = vrot.lane.b32.xlu0 %v332_v56, %s550_s3 }
 0x207   :  { %v232_v58 = vpop.xlane.xlu1 %231 }
 0x208   :  { %v236_v59 = vadd.f32 %v232_v58, %v224_v57 }
 0x20a   :  { %238 = vst.msk [vmem:[#allocation6] sm:$0xff] %vm119_vm0, %v236_v59 }
 0x211   :  { %v291_v4 = vld [vmem:[#allocation6] sm:$0xff] }
 0x212   :  { %v293_v5 = vsub.f32 -0.87920934, %v291_v4 }
 0x214   :  { %v295_v60 = vadd.f32 %v293_v5, %v285_v27 }
 0x216   :  { %v299_v62 = vsel %vm206_vm2, 0.0, %v295_v60 }
 0x217   :  { %v301_v63 = vadd.f32 %v299_v62, %v297_v61 }
 0x219   :  { %303 = vst.msk [vmem:[#allocation2] sm:$0xff] %vm119_vm0, %v301_v63 }
 0x220   :  { %v347_v49 = vld [vmem:[#allocation2] sm:$0xff] }
 0x221   :  { %v349_v13 = vsel %vm119_vm0, %v347_v49, 0.0 }
 0x238   :  { %v235_v3 = vpop.xlane.xlu2 %234 }
 0x239   :  { %v237_v6 = vadd.f32 %v235_v3, %v225_v0 }
 0x23b   :  { %239 = vst.msk [vmem:[#allocation6 + $0x8] sm:$0xff] %vm119_vm0, %v237_v6 }
 0x242   :  { %v292_v7 = vld [vmem:[#allocation6 + $0x8] sm:$0xff] }
 0x243   :  { %v294_v8 = vsub.f32 -0.87920934, %v292_v7 }
 0x245   :  { %v296_v9 = vadd.f32 %v294_v8, %v286_v40 }
 0x247   :  { %v300_v11 = vsel %vm207_vm1, 0.0, %v296_v9 }
 0x248   :  { %v302_v12 = vadd.f32 %v300_v11, %v298_v10 }
 0x24a   :  { %304 = vst.msk [vmem:[#allocation2 + $0x8] sm:$0xff] %vm119_vm0, %v302_v12 }
 0x251   :  { %v348_v14 = vld [vmem:[#allocation2 + $0x8] sm:$0xff] }
 0x252   :  { %v350_v15 = vsel %vm119_vm0, %v348_v14, 0.0 }
 0x253   :  { %v351_v16 = vadd.f32 %v350_v15, %v349_v13 }
 0x255   :  { %352 = vadd.xlane.f32.xlu0 %v351_v16 }
 0x262   :  { %v336_v18 = vpop.permute.xlu1 %335 }
 0x263   :  { %v341_v19 = vadd.f32 %v336_v18, %v321_v17 }
 0x265   :  { %343 = vst.msk [vmem:[#allocation3] sm:$0xff] %vm119_vm0, %v341_v19 }
 0x26a   :  { %v338_v21 = vpop.permute.xlu0 %337 }
 0x26b   :  { %v342_v46 = vadd.f32 %v338_v21, %v322_v20 }
 0x26c   :  { %v363_v22 = vld [vmem:[#allocation3] sm:$0xff] }
 0x26d   :  { %344 = vst.msk [vmem:[#allocation3 + $0x8] sm:$0xff] %vm119_vm0, %v342_v46  ;;  %v365_v24 = vsel %vm119_vm0, %v363_v22, 0.0 }
 0x274   :  { %v364_v23 = vld [vmem:[#allocation3 + $0x8] sm:$0xff] }
 0x275   :  { %v366_v25 = vsel %vm119_vm0, %v364_v23, 0.0 }
 0x276   :  { %v367_v26 = vadd.f32 %v366_v25, %v365_v24 }
 0x278   :  { %368 = vadd.xlane.f32.xlu1 %v367_v26 }
 0x2c8   :  { %v353_v27 = vpop.xlane.xlu0 %352 }
 0x2c9   :  { %v354_v28 = vrot.slane %v353_v27, 4 }
 0x2cb   :  { %v355_v29 = vadd.f32 %v354_v28, %v353_v27 }
 0x2cd   :  { %v356_v30 = vrot.slane %v355_v29, 2 }
 0x2cf   :  { %v357_v31 = vadd.f32 %v356_v30, %v355_v29 }
 0x2d1   :  { %v358_v32 = vrot.slane %v357_v31, 1 }
 0x2d3   :  { %v359_v33 = vadd.f32 %v358_v32, %v357_v31 }
 0x2d5   :  { %430 = vpush %v359_v33 }
 0x2eb   :  { %v369_v34 = vpop.xlane.xlu1 %368 }
 0x2ec   :  { %v370_v35 = vrot.slane %v369_v34, 4 }
 0x2ee   :  { %v371_v36 = vadd.f32 %v370_v35, %v369_v34 }
 0x2f0   :  { %v372_v37 = vrot.slane %v371_v36, 2 }
 0x2f2   :  { %v373_v38 = vadd.f32 %v372_v37, %v371_v36 }
 0x2f4   :  { %v374_v39 = vrot.slane %v373_v38, 1 }
 0x2f6   :  { %v375_v40 = vadd.f32 %v374_v39, %v373_v38 }
 0x2f8   :  { %432 = vpush %v375_v40 }
 0x306   :  { %s431_s19 = spop %430 }
 0x307   :  { %v361_v41 = vstv %s431_s19 }
 0x308   :  { %362 = vst [vmem:[#allocation12] sm:$0xff] %v361_v41 }
 0x309   :  { %389 = dma.vmem_to_hbm [thread:$0]  %s385_s15, 128, %s387_s18, [#allocation11]  }
 0x329   :  { %s433_s25 = spop %432 }
 0x32a   :  { %v377_v42 = vstv %s433_s25 }
 0x32b   :  { %378 = vst [vmem:[#allocation13] sm:$0xff] %v377_v42 }
 0x32c   :  { %400 = dma.vmem_to_hbm [thread:$0]  %s396_s21, 128, %s398_s24, [#allocation14]  }
 0x32d   :  { %538 = dma.done.wait [#allocation11], 128  }
 0x32e   :  { %539 = vsyncadd [#allocation11], 4294967168 }
 0x32f   :  { %540 = dma.done.wait [#allocation14], 128  }
 0x330   :  { %541 = vsyncadd [#allocation14], 4294967168 }
 0x331   :  { %409 = vsyncpa [#allocation10], 1 }
 0x332   :  { %410 = vsyncpa [#allocation11], 1 }
 0x333   :  { %411 = vsyncpa [#allocation14], 1 }

</bundles_post_ra>
